<compile_context>
chip_gen: v6e
topology: v6e:2x2x1
jax: 0.10.0
libtpu: 0.0.40
codegen_flags: <defaults>
</compile_context>

<pallas_src>
import functools

import jax
import jax.numpy as jnp
from jax.experimental import pallas as pl
from jax.experimental.pallas import tpu as pltpu

_LANE = 128
_SUBLANE = 8
# Explicit scoped-VMEM limit: default is only 16 MiB on v5e / 32 MiB on v6e+.
# 48 MiB still leaves headroom inside v7x's 64 MiB physical VMEM.
_VMEM_LIMIT_BYTES = 48 * 1024 * 1024
# ~4 MiB fp32 per tile buffer: apply pass double-buffers in+out (~16 MiB total),
# stats pass double-buffers the input (~8 MiB) -> safe on v5e/v6e/v7x while
# large enough to stream near the HBM roofline.
_TARGET_TILE_ELEMS = 1 << 20


def _pick_tiles(rows, cols):
    """Pick (tr, tc) tiles for a (rows, cols) array with cols on the lane axis."""
    # Column (lane) tile: full dim if moderate (block == full dim is always
    # legal), else a multiple of 128 (ragged tail handled by masking / dropped
    # out-of-bounds writes).
    if cols <= max(4096, _LANE):
        tc = cols
    else:
        tc = 4096
    # Row (sublane) tile: fill up to the target element budget.
    max_tr = max(1, _TARGET_TILE_ELEMS // tc)
    if rows <= max(max_tr, _SUBLANE):
        tr = rows                      # full dim -> always legal, no ragged rows
    else:
        tr = max(_SUBLANE, (max_tr // _SUBLANE) * _SUBLANE)
    return tr, tc


# ---------------------------------------------------------------------------
# Kernel 1: per-row sum and sum-of-squares (reduction over the lane axis, with
# accumulation over column tiles).  Row sums are folded per-channel in the
# wrapper (tiny (N*C,) arrays).
# ---------------------------------------------------------------------------
def _stats_kernel(x_ref, sum_ref, sq_ref, *, cols, tc, cols_ragged):
    @pl.when(pl.program_id(1) == 0)
    def _():
        sum_ref[...] = jnp.zeros_like(sum_ref)
        sq_ref[...] = jnp.zeros_like(sq_ref)

    x = x_ref[...].astype(jnp.float32)
    if cols_ragged:
        # Mask padded lanes of the last column tile so they contribute zero.
        j = pl.program_id(1)
        col = jax.lax.broadcasted_iota(jnp.int32, x.shape, 1) + j * tc
        x = jnp.where(col < cols, x, 0.0)

    sum_ref[...] += jnp.sum(x, axis=1, keepdims=True)   # (tr, 1)
    sq_ref[...] += jnp.sum(x * x, axis=1, keepdims=True)


def _row_stats(x2d):
    rows, cols = x2d.shape
    tr, tc = _pick_tiles(rows, cols)
    grid = (pl.cdiv(rows, tr), pl.cdiv(cols, tc))
    kernel = functools.partial(
        _stats_kernel, cols=cols, tc=tc, cols_ragged=(cols % tc != 0))
    s, sq = pl.pallas_call(
        kernel,
        out_shape=(jax.ShapeDtypeStruct((rows, 1), jnp.float32),
                   jax.ShapeDtypeStruct((rows, 1), jnp.float32)),
        grid=grid,
        in_specs=[pl.BlockSpec((tr, tc), lambda i, j: (i, j))],
        out_specs=(pl.BlockSpec((tr, 1), lambda i, j: (i, 0)),
                   pl.BlockSpec((tr, 1), lambda i, j: (i, 0))),
        compiler_params=pltpu.CompilerParams(
            dimension_semantics=("parallel", "arbitrary"),
            vmem_limit_bytes=_VMEM_LIMIT_BYTES),
    )(x2d)
    return s[:, 0], sq[:, 0]


# ---------------------------------------------------------------------------
# Kernel 2: elementwise normalize + affine:  y = x * scale_row + shift_row
# (scale/shift are per-row, i.e. per-(n, c), broadcast along the lane axis).
# ---------------------------------------------------------------------------
def _apply_kernel(x_ref, scale_ref, shift_ref, o_ref):
    x = x_ref[...].astype(jnp.float32)
    o_ref[...] = (x * scale_ref[...] + shift_ref[...]).astype(o_ref.dtype)


def _bn_apply(x2d, scale_rows, shift_rows):
    rows, cols = x2d.shape
    tr, tc = _pick_tiles(rows, cols)
    grid = (pl.cdiv(rows, tr), pl.cdiv(cols, tc))
    return pl.pallas_call(
        _apply_kernel,
        out_shape=jax.ShapeDtypeStruct((rows, cols), x2d.dtype),
        grid=grid,
        in_specs=[
            pl.BlockSpec((tr, tc), lambda i, j: (i, j)),
            pl.BlockSpec((tr, 1), lambda i, j: (i, 0)),
            pl.BlockSpec((tr, 1), lambda i, j: (i, 0)),
        ],
        out_specs=pl.BlockSpec((tr, tc), lambda i, j: (i, j)),
        compiler_params=pltpu.CompilerParams(
            dimension_semantics=("parallel", "parallel"),
            vmem_limit_bytes=_VMEM_LIMIT_BYTES),
    )(x2d, scale_rows, shift_rows)


# ---------------------------------------------------------------------------
# Functional WSBNFull forward.
# ---------------------------------------------------------------------------
def wsbn_full_forward(x, x_id, weight, bias, running_mean, running_var,
                      eps=1e-5, momentum=0.1, training=True, affine=True):
    """x: (N, C, H, W) NCHW.  x_id: static python int.  Returns (y, new_rm, new_rv)."""
    n, c, h, w = x.shape
    hw = h * w
    count = n * hw
    # Zero-copy view of contiguous NCHW: row i corresponds to channel i % C.
    x2d = x.reshape(n * c, hw)

    gamma = weight[x_id].astype(jnp.float32) if affine else jnp.ones((c,), jnp.float32)
    beta = bias[x_id].astype(jnp.float32) if affine else jnp.zeros((c,), jnp.float32)
    rm = running_mean[x_id].astype(jnp.float32)
    rv = running_var[x_id].astype(jnp.float32)

    if training:
        row_sum, row_sq = _row_stats(x2d)                       # (N*C,), (N*C,)
        ch_sum = row_sum.reshape(n, c).sum(axis=0)              # tiny fold in wrapper
        ch_sq = row_sq.reshape(n, c).sum(axis=0)
        mean = ch_sum / count
        # E[x^2] - mean^2 in fp32; clamp tiny negative cancellation residue.
        # TODO(synk): switch to a centered/compensated second-moment pass if
        # activations can have very large mean/std ratios.
        var = jnp.maximum(ch_sq / count - mean * mean, 0.0)     # biased (normalization)
        unbiased = var * (count / max(count - 1, 1))
        new_rm = running_mean.at[x_id].set((1.0 - momentum) * rm + momentum * mean)
        new_rv = running_var.at[x_id].set((1.0 - momentum) * rv + momentum * unbiased)
    else:
        mean, var = rm, rv
        new_rm, new_rv = running_mean, running_var

    inv_std = jax.lax.rsqrt(var + eps)
    scale_c = gamma * inv_std                                   # (C,)
    shift_c = beta - mean * scale_c                             # (C,)
    # Per-row (per (n, c)) scale/shift: tiny (N*C, 1) arrays.
    scale_rows = jnp.tile(scale_c, n).reshape(n * c, 1).astype(jnp.float32)
    shift_rows = jnp.tile(shift_c, n).reshape(n * c, 1).astype(jnp.float32)

    y2d = _bn_apply(x2d, scale_rows, shift_rows)                # Pallas hot path
    y = y2d.reshape(n, c, h, w)                                 # zero-copy back to NCHW
    return y, new_rm, new_rv


# ---------------------------------------------------------------------------
# Pure-JAX references (mirror F.batch_norm) for silent correctness checks.
# ---------------------------------------------------------------------------
def _reference_train(x, gamma, beta, eps):
    mean = jnp.mean(x, axis=(0, 2, 3), keepdims=True)
    var = jnp.mean((x - mean) ** 2, axis=(0, 2, 3), keepdims=True)
    xn = (x - mean) * jax.lax.rsqrt(var + eps)
    return xn * gamma.reshape(1, -1, 1, 1) + beta.reshape(1, -1, 1, 1)


def _reference_eval(x, gamma, beta, rm, rv, eps):
    xn = (x - rm.reshape(1, -1, 1, 1)) * jax.lax.rsqrt(rv.reshape(1, -1, 1, 1) + eps)
    return xn * gamma.reshape(1, -1, 1, 1) + beta.reshape(1, -1, 1, 1)


if __name__ == "__main__":
    key = jax.random.PRNGKey(0)
    k1, k2, k3 = jax.random.split(key, 3)

    # Small shapes consistent with the module: batch=2, channels=4, spatial=16.
    N, C, H, W = 2, 4, 16, 16
    num_possible_inputs = 3
    eps, momentum = 1e-5, 0.1
    x_id = 1

    x = jax.random.normal(k1, (N, C, H, W), jnp.float32)
    # Parameter shapes from __init__: num_possible_inputs x (num_features,)
    weight = 1.0 + 0.1 * jax.random.normal(k2, (num_possible_inputs, C), jnp.float32)
    bias = 0.1 * jax.random.normal(k3, (num_possible_inputs, C), jnp.float32)
    # Buffers as filled by reset_parameters(): running_mean=1, running_var=0.
    running_mean = jnp.ones((num_possible_inputs, C), jnp.float32)
    running_var = jnp.zeros((num_possible_inputs, C), jnp.float32)

    # --- training mode (batch stats + running-stat update) -----------------
    y, new_rm, new_rv = wsbn_full_forward(
        x, x_id, weight, bias, running_mean, running_var,
        eps=eps, momentum=momentum, training=True, affine=True)
    jax.block_until_ready(y)

    y_ref = _reference_train(x, weight[x_id], bias[x_id], eps)
    assert jnp.allclose(y, y_ref, atol=1e-4, rtol=1e-4), "train output mismatch"

    count = N * H * W
    mean_ref = jnp.mean(x, axis=(0, 2, 3))
    var_b_ref = jnp.mean((x - mean_ref.reshape(1, -1, 1, 1)) ** 2, axis=(0, 2, 3))
    var_u_ref = var_b_ref * (count / (count - 1))
    rm_ref = (1 - momentum) * 1.0 + momentum * mean_ref
    rv_ref = (1 - momentum) * 0.0 + momentum * var_u_ref
    assert jnp.allclose(new_rm[x_id], rm_ref, atol=1e-5), "running mean mismatch"
    assert jnp.allclose(new_rv[x_id], rv_ref, atol=1e-4, rtol=1e-4), "running var mismatch"

    # --- eval mode (uses stored running stats, no update) -------------------
    y_ev, rm_ev, rv_ev = wsbn_full_forward(
        x, x_id, weight, bias, new_rm, new_rv,
        eps=eps, momentum=momentum, training=False, affine=True)
    jax.block_until_ready(y_ev)
    y_ev_ref = _reference_eval(x, weight[x_id], bias[x_id],
                               new_rm[x_id], new_rv[x_id], eps)
    assert jnp.allclose(y_ev, y_ev_ref, atol=1e-3, rtol=1e-4), "eval output mismatch"
    assert jnp.array_equal(rm_ev, new_rm) and jnp.array_equal(rv_ev, new_rv)

    print("KERNEL_OK")
</pallas_src>

<mosaic_0001>
module attributes {stable_mosaic.version = 11 : i64} {
  func.func @_stats_kernel(%arg0: i32, %arg1: i32, %arg2: memref<8x256xf32, #tpu.memory_space<vmem>>, %arg3: memref<8x1xf32, #tpu.memory_space<vmem>>, %arg4: memref<8x1xf32, #tpu.memory_space<vmem>>) attributes {dimension_semantics = [#tpu.dimension_semantics<parallel>, #tpu.dimension_semantics<arbitrary>], iteration_bounds = array<i64: 1, 1>, scalar_prefetch = 0 : i64, scratch_operands = 0 : i64, tpu.core_type = #tpu.core_type<tc>, window_params = [{transform_indices = @transform_0, window_bounds = array<i64: 8, 256>}, {transform_indices = @transform_1, window_bounds = array<i64: 8, 1>}, {transform_indices = @transform_2, window_bounds = array<i64: 8, 1>}]} {
    %c0_i32 = arith.constant 0 : i32
    %0 = arith.cmpi eq, %arg1, %c0_i32 : i32
    %1 = arith.extui %0 : i1 to i32
    %c0_i32_0 = arith.constant 0 : i32
    %2 = arith.cmpi ne, %1, %c0_i32_0 : i32
    scf.if %2 {
      %cst_11 = arith.constant 0.000000e+00 : f32
      %15 = vector.broadcast %cst_11 : f32 to vector<8x1xf32>
      %c0_12 = arith.constant 0 : index
      %c0_13 = arith.constant 0 : index
      %16 = vector.load %arg3[%c0_12, %c0_13] : memref<8x1xf32, #tpu.memory_space<vmem>>, vector<8x1xf32>
      tpu.vector_store %arg3[%c0_12, %c0_13], %15 {strides = array<i32>} : memref<8x1xf32, #tpu.memory_space<vmem>>, vector<8x1xf32>,
      %cst_14 = arith.constant 0.000000e+00 : f32
      %17 = vector.broadcast %cst_14 : f32 to vector<8x1xf32>
      %c0_15 = arith.constant 0 : index
      %c0_16 = arith.constant 0 : index
      %18 = vector.load %arg4[%c0_15, %c0_16] : memref<8x1xf32, #tpu.memory_space<vmem>>, vector<8x1xf32>
      tpu.vector_store %arg4[%c0_15, %c0_16], %17 {strides = array<i32>} : memref<8x1xf32, #tpu.memory_space<vmem>>, vector<8x1xf32>,
    } else {
    }
    %c0 = arith.constant 0 : index
    %c0_1 = arith.constant 0 : index
    %3 = vector.load %arg2[%c0, %c0_1] : memref<8x256xf32, #tpu.memory_space<vmem>>, vector<8x256xf32>
    %c0_2 = arith.constant 0 : index
    %c0_3 = arith.constant 0 : index
    %4 = vector.load %arg3[%c0_2, %c0_3] : memref<8x1xf32, #tpu.memory_space<vmem>>, vector<8x1xf32>
    %cst = arith.constant dense<0.000000e+00> : vector<8xf32>
    %5 = vector.multi_reduction <add>, %3, %cst [1] : vector<8x256xf32> to vector<8xf32>
    %6 = vector.shape_cast %5 : vector<8xf32> to vector<8x1xf32>
    %7 = arith.addf %4, %6 : vector<8x1xf32>
    %c0_4 = arith.constant 0 : index
    %c0_5 = arith.constant 0 : index
    %8 = vector.load %arg3[%c0_4, %c0_5] : memref<8x1xf32, #tpu.memory_space<vmem>>, vector<8x1xf32>
    tpu.vector_store %arg3[%c0_4, %c0_5], %7 {strides = array<i32>} : memref<8x1xf32, #tpu.memory_space<vmem>>, vector<8x1xf32>,
    %c0_6 = arith.constant 0 : index
    %c0_7 = arith.constant 0 : index
    %9 = vector.load %arg4[%c0_6, %c0_7] : memref<8x1xf32, #tpu.memory_space<vmem>>, vector<8x1xf32>
    %10 = arith.mulf %3, %3 : vector<8x256xf32>
    %cst_8 = arith.constant dense<0.000000e+00> : vector<8xf32>
    %11 = vector.multi_reduction <add>, %10, %cst_8 [1] : vector<8x256xf32> to vector<8xf32>
    %12 = vector.shape_cast %11 : vector<8xf32> to vector<8x1xf32>
    %13 = arith.addf %9, %12 : vector<8x1xf32>
    %c0_9 = arith.constant 0 : index
    %c0_10 = arith.constant 0 : index
    %14 = vector.load %arg4[%c0_9, %c0_10] : memref<8x1xf32, #tpu.memory_space<vmem>>, vector<8x1xf32>
    tpu.vector_store %arg4[%c0_9, %c0_10], %13 {strides = array<i32>} : memref<8x1xf32, #tpu.memory_space<vmem>>, vector<8x1xf32>,
    return
  }
  func.func @transform_0(%arg0: i32, %arg1: i32) -> (i32, i32) {
    %c0_i32 = arith.constant 0 : i32
    return %arg0, %arg1 : i32, i32
  }
  func.func @transform_1(%arg0: i32, %arg1: i32) -> (i32, i32) {
    %c0_i32 = arith.constant 0 : i32
    %c0_i32_0 = arith.constant 0 : i32
    return %arg0, %c0_i32 : i32, i32
  }
  func.func @transform_2(%arg0: i32, %arg1: i32) -> (i32, i32) {
    %c0_i32 = arith.constant 0 : i32
    %c0_i32_0 = arith.constant 0 : i32
    return %arg0, %c0_i32 : i32, i32
  }
}

</mosaic_0001>

<bundles_post_ra>
// kernel: tpu_custom_call.1
= control target key start
LH: loop header
LB: loop body
LE: loop exit
PB: predicated region body
PF: predicated region fallthrough
CT: control target
= control target key end

     0   :  { %8 = vsyncpa [#allocation3], 0  ;;  %s79_s9 = smov [#allocation2]   ;;  %s121_s0 = inlined_call_operand.hbm [shape: f32[8,256], index: 0, kind: input, shape index: {}]   ;;  %s122_s1 = inlined_call_operand.vmem [shape: f32[8,1], index: 1, kind: output, shape index: {0}]   ;;  %s123_s2 = inlined_call_operand.vmem [shape: f32[8,1], index: 2, kind: output, shape index: {1}]  }
   0x1   :  { %s15_s10 = sshll.u32 %s79_s9, 4  ;;  %s16_s10 = int_to_ptr.vmem [resolvable:$true] %s15_s10 }
   0x2   :  { %s65_s11 = scalar_lea.vmem %s16_s10, 256  ;;  %p70_p1 = scmp.lt.s32.totalorder %s16_s10, %s16_s10 }
   0x3   :  { %p66_p0 = scmp.ne.s32.totalorder %s16_s10, %s65_s11  ;;  %p71_p2 = scmp.lt.s32.totalorder %s65_s11, %s65_s11 }
   0x5   :  { %p72_p3 = por %p71_p2, %p70_p1 }
   0x7   :  { %p73_p4 = pnand %p72_p3, %p66_p0 }
   0x9   :  { %76 = shalt.err (!%p73_p4)
}
   0xa   :  { %18 = dma.hbm_to_vmem [thread:$0]  %s121_s0, 256, %s16_s10, [#allocation3]  }
   0xb   :  { %77 = dma.done.wait [#allocation3], 256  }
   0xc   :  { %78 = vsyncadd [#allocation3], 4294967040  ;;  %vm26_vm0 = vcmask 7168   ;;  %v80_v0 = vmov 0.0   ;;  %v29_v1 = vld [vmem:[#allocation2] sm:$0xff]  ;;  %v30_v2 = vld [vmem:[#allocation2 + $0x8] sm:$0xff] }
   0xd   :  { %27 = vst.msk [vmem:[%s122_s1] sm:$0xff] %vm26_vm0, %v80_v0  ;;  %28 = vst.msk [vmem:[%s123_s2] sm:$0xff] %vm26_vm0, %v80_v0  ;;  %v32_v3 = vadd.f32 %v30_v2, %v29_v1  ;;  %v39_v4 = vmul.f32 %v29_v1, %v29_v1  ;;  %v40_v5 = vmul.f32 %v30_v2, %v30_v2 }
   0xf   :  { %33 = vadd.xlane.f32.xlu0 %v32_v3  ;;  %v41_v6 = vadd.f32 %v40_v5, %v39_v4 }
  0x13   :  { %42 = vadd.xlane.f32.xlu0 %v41_v6 }
  0x14   :  { %v31_v7 = vld [vmem:[%s122_s1] sm:$0xff] }
  0x15   :  { %v38_v10 = vld [vmem:[%s123_s2] sm:$0xff] }
  0x98   :  { %v34_v8 = vpop.xlane.xlu0 %33 }
  0x99   :  { %v35_v9 = vadd.f32 %v34_v8, %v31_v7 }
  0x9b   :  { %37 = vst.msk [vmem:[%s122_s1] sm:$0xff] %vm26_vm0, %v35_v9 }
  0x9c   :  { %v43_v11 = vpop.xlane.xlu0 %42 }
  0x9d   :  { %v44_v12 = vadd.f32 %v43_v11, %v38_v10 }
  0x9f   :  { %45 = vst.msk [vmem:[%s123_s2] sm:$0xff] %vm26_vm0, %v44_v12 }
  0xa0   :  { %54 = vsyncpa [#allocation3], 1 }

</bundles_post_ra>
